<compile_context>
chip_gen: v7x
topology: tpu7x:2x2x1
jax: 0.10.0
libtpu: 0.0.40
codegen_flags: <defaults>
</compile_context>

<pallas_src>
import functools

import jax
import jax.numpy as jnp
from jax.experimental import pallas as pl
from jax.experimental.pallas import tpu as pltpu


# --------------------------------------------------------------------------
# Helpers
# --------------------------------------------------------------------------

def _row_tile(m, target=256):
    """Row-tile size for the (B*N)-gridded kernels.

    target=256 keeps the fused proj+MLP kernel's VMEM footprint (resident
    weights + double-buffered activation tiles) around ~15 MiB at ViT scale
    (C=384, hidden=1536), well inside the 32 MiB scoped default and v7x's
    64 MiB physical VMEM.
    """
    if m <= target:
        return m                       # single full block (always legal)
    return max(8, (target // 8) * 8)   # multiple of 8 sublanes


def _softmax_last(s):
    # Max-subtracted softmax; reciprocal runs on the otherwise-idle EUP slot.
    s = s - jnp.max(s, axis=-1, keepdims=True)
    e = jnp.exp(s)
    return e * pl.reciprocal(jnp.sum(e, axis=-1, keepdims=True), approx=True)


def _layernorm(x, g, b, eps):
    mu = jnp.mean(x, axis=-1, keepdims=True)
    xc = x - mu
    var = jnp.mean(xc * xc, axis=-1, keepdims=True)
    return xc * jax.lax.rsqrt(var + eps) * g + b


# --------------------------------------------------------------------------
# Kernel 1: fused LayerNorm1 + QKV projection  (row-tiled grid over M = B*N)
# --------------------------------------------------------------------------

def _ln_qkv_kernel(x_ref, g_ref, b_ref, w_ref, o_ref, *, eps, mxu_dtype):
    xn = _layernorm(x_ref[...], g_ref[...], b_ref[...], eps)
    o_ref[...] = jnp.dot(xn.astype(mxu_dtype), w_ref[...].astype(mxu_dtype),
                         preferred_element_type=jnp.float32)


def ln_qkv(x2d, gamma, beta, w_qkv, eps=1e-5, mxu_dtype=jnp.float32):
    m, c = x2d.shape
    n = w_qkv.shape[1]
    tm = _row_tile(m)
    return pl.pallas_call(
        functools.partial(_ln_qkv_kernel, eps=eps, mxu_dtype=mxu_dtype),
        out_shape=jax.ShapeDtypeStruct((m, n), jnp.float32),
        grid=(pl.cdiv(m, tm),),
        in_specs=[
            pl.BlockSpec((tm, c), lambda i: (i, 0)),     # x rows (pipelined)
            pl.BlockSpec((1, c), lambda i: (0, 0)),      # ln gamma (resident)
            pl.BlockSpec((1, c), lambda i: (0, 0)),      # ln beta  (resident)
            pl.BlockSpec((c, n), lambda i: (0, 0)),      # W_qkv    (resident)
        ],
        out_specs=pl.BlockSpec((tm, n), lambda i: (i, 0)),
        compiler_params=pltpu.CompilerParams(
            dimension_semantics=("parallel",)),
    )(x2d, gamma.reshape(1, c), beta.reshape(1, c), w_qkv)


# --------------------------------------------------------------------------
# Kernel 2: prompt QKV, computed ONCE on (P, C) (identical across batch)
# --------------------------------------------------------------------------

def _matmul_kernel(a_ref, w_ref, o_ref, *, mxu_dtype):
    o_ref[...] = jnp.dot(a_ref[...].astype(mxu_dtype),
                         w_ref[...].astype(mxu_dtype),
                         preferred_element_type=jnp.float32)


def prompt_qkv(prompt, w_qkv, mxu_dtype=jnp.float32):
    p, c = prompt.shape
    n = w_qkv.shape[1]
    return pl.pallas_call(
        functools.partial(_matmul_kernel, mxu_dtype=mxu_dtype),
        out_shape=jax.ShapeDtypeStruct((p, n), jnp.float32),
        in_specs=[pl.BlockSpec(memory_space=pltpu.MemorySpace.VMEM)] * 2,
        out_specs=pl.BlockSpec(memory_space=pltpu.MemorySpace.VMEM),
    )(prompt, w_qkv)


# --------------------------------------------------------------------------
# Kernel 3: attention.  grid=(B,); all heads in one step; lane-dense (N, C)
# output written straight into (B, N, C) -- no JAX-side head transposes.
# Heads are sliced from the (N, 3C) qkv slab at column offsets h*D.
# --------------------------------------------------------------------------

def _attn_kernel(gate_ref, qkv_ref, pkv_ref, o_ref, *, num_heads, scale,
                 mxu_dtype):
    N = qkv_ref.shape[1]
    C = qkv_ref.shape[2] // 3
    H = num_heads
    D = C // H

    qkv = qkv_ref[0]            # (N, 3C)  -- this batch's q|k|v slab
    pkv = pkv_ref[...]          # (P, 3C)  -- shared prompt q|k|v slab
    dn = (((1,), (1,)), ((), ()))  # a @ b^T (contract the head_dim axis)

    outs = []
    for h in range(H):          # unrolled at trace time (H is static)
        q = (qkv[:, h * D:(h + 1) * D] * scale).astype(mxu_dtype)
        k = qkv[:, C + h * D:C + (h + 1) * D].astype(mxu_dtype)
        v = qkv[:, 2 * C + h * D:2 * C + (h + 1) * D].astype(mxu_dtype)
        pk = pkv[:, C + h * D:C + (h + 1) * D].astype(mxu_dtype)
        pv = pkv[:, 2 * C + h * D:2 * C + (h + 1) * D].astype(mxu_dtype)

        # self attention over x tokens
        s = jax.lax.dot_general(q, k, dn, preferred_element_type=jnp.float32)
        p = _softmax_last(s)
        o = jnp.dot(p.astype(mxu_dtype), v, preferred_element_type=jnp.float32)

        # prompt cross attention (PyTorch applies softmax twice -- reproduced)
        ps = jax.lax.dot_general(q, pk, dn, preferred_element_type=jnp.float32)
        pp = _softmax_last(_softmax_last(ps))
        o = o + gate_ref[h] * jnp.dot(pp.astype(mxu_dtype), pv,
                                      preferred_element_type=jnp.float32)
        outs.append(o)

    # concat heads along lanes -> (N, C), single dense store
    o_ref[0] = jnp.concatenate(outs, axis=-1).astype(o_ref.dtype)


def attn_core(qkv_b, pkv, gate, scale, num_heads, mxu_dtype=jnp.float32):
    B, N, C3 = qkv_b.shape
    C = C3 // 3
    P = pkv.shape[0]
    return pl.pallas_call(
        functools.partial(_attn_kernel, num_heads=num_heads, scale=scale,
                          mxu_dtype=mxu_dtype),
        out_shape=jax.ShapeDtypeStruct((B, N, C), jnp.float32),
        grid=(B,),
        in_specs=[
            pl.BlockSpec(memory_space=pltpu.MemorySpace.SMEM),   # gate (H,)
            pl.BlockSpec((1, N, C3), lambda b: (b, 0, 0)),       # qkv per batch
            pl.BlockSpec((P, C3), lambda b: (0, 0)),             # prompt kv (shared)
        ],
        out_specs=pl.BlockSpec((1, N, C), lambda b: (b, 0, 0)),
        compiler_params=pltpu.CompilerParams(
            dimension_semantics=("parallel",)),
    )(gate, qkv_b, pkv)


# --------------------------------------------------------------------------
# Kernel 4: fused proj + residual + LayerNorm2 + MLP + ad_gate residual
# (row-tiled grid over M = B*N; all weights resident via constant index_maps)
# --------------------------------------------------------------------------

def _proj_mlp_kernel(adg_ref, res_ref, a_ref, wp_ref, bp_ref,
                     g2_ref, be2_ref, w1_ref, b1_ref, w2_ref, b2_ref,
                     o_ref, *, eps, mxu_dtype):
    # x1 = x + attn_out @ W_proj + b_proj
    x1 = (res_ref[...]
          + jnp.dot(a_ref[...].astype(mxu_dtype), wp_ref[...].astype(mxu_dtype),
                    preferred_element_type=jnp.float32)
          + bp_ref[...])
    # norm2
    xn = _layernorm(x1, g2_ref[...], be2_ref[...], eps)
    # mlp
    h = jnp.dot(xn.astype(mxu_dtype), w1_ref[...].astype(mxu_dtype),
                preferred_element_type=jnp.float32) + b1_ref[...]
    # nn.GELU default is exact erf; approximate=True would be cheaper (numerics change).
    h = jax.nn.gelu(h, approximate=False)
    m = jnp.dot(h.astype(mxu_dtype), w2_ref[...].astype(mxu_dtype),
                preferred_element_type=jnp.float32) + b2_ref[...]
    # TODO(synk): AdapterSuper (self.adapter) is undefined in the source; treated as identity.
    o_ref[...] = adg_ref[0] * m + x1


def proj_mlp_residual(res2d, attn2d, w_proj, b_proj, ln2_g, ln2_b,
                      w1, b1, w2, b2, ad_gate, eps=1e-5,
                      mxu_dtype=jnp.float32):
    m, c = res2d.shape
    hid = w1.shape[1]
    tm = _row_tile(m)
    row = lambda i: (i, 0)
    const = lambda i: (0, 0)
    return pl.pallas_call(
        functools.partial(_proj_mlp_kernel, eps=eps, mxu_dtype=mxu_dtype),
        out_shape=jax.ShapeDtypeStruct((m, c), jnp.float32),
        grid=(pl.cdiv(m, tm),),
        in_specs=[
            pl.BlockSpec(memory_space=pltpu.MemorySpace.SMEM),  # ad_gate (1,)
            pl.BlockSpec((tm, c), row),     # residual rows
            pl.BlockSpec((tm, c), row),     # attention-out rows
            pl.BlockSpec((c, c), const),    # W_proj   (resident)
            pl.BlockSpec((1, c), const),    # b_proj
            pl.BlockSpec((1, c), const),    # ln2 gamma
            pl.BlockSpec((1, c), const),    # ln2 beta
            pl.BlockSpec((c, hid), const),  # W1       (resident)
            pl.BlockSpec((1, hid), const),  # b1
            pl.BlockSpec((hid, c), const),  # W2       (resident)
            pl.BlockSpec((1, c), const),    # b2
        ],
        out_specs=pl.BlockSpec((tm, c), row),
        compiler_params=pltpu.CompilerParams(
            dimension_semantics=("parallel",)),
    )(ad_gate, res2d, attn2d, w_proj, b_proj.reshape(1, c),
      ln2_g.reshape(1, c), ln2_b.reshape(1, c),
      w1, b1.reshape(1, hid), w2, b2.reshape(1, c))


# --------------------------------------------------------------------------
# Block forward (thin glue; only free reshapes between kernels)
# --------------------------------------------------------------------------

def block_forward(params, x, mxu_dtype=jnp.float32):
    B, N, C = x.shape
    H = params["num_heads"]
    D = C // H
    scale = D ** (-0.5)  # qk_scale=None -> head_dim ** -0.5

    # prompt_dropout (p=0.1) is identity at inference time; prompt k/v are
    # identical across batch, so compute the projection once on (P, C).
    # TODO(synk): cp_feat branch (topk against a .pt cache + cp_adapter) not reproduced.
    pkv = prompt_qkv(params["prompt"], params["w_qkv"], mxu_dtype)      # (P, 3C)

    # --- x = x + attn(norm1(x), prompt) ---
    qkv = ln_qkv(x.reshape(B * N, C), params["ln1_g"], params["ln1_b"],
                 params["w_qkv"], mxu_dtype=mxu_dtype)                  # (B*N, 3C)
    attn = attn_core(qkv.reshape(B, N, 3 * C), pkv, params["gate"],
                     scale, H, mxu_dtype)                               # (B, N, C)

    # --- x = ad_gate * adapter(drop_path(mlp(norm2(x)))) + x  (drop_path=0 -> id) ---
    out = proj_mlp_residual(x.reshape(B * N, C), attn.reshape(B * N, C),
                            params["w_proj"], params["b_proj"],
                            params["ln2_g"], params["ln2_b"],
                            params["w1"], params["b1"],
                            params["w2"], params["b2"],
                            params["ad_gate"], mxu_dtype=mxu_dtype)

    # TODO(synk): downstream grouping / pooling(BatchNorm1d) / propagate / adapter1
    # path needs undefined helpers (AdapterSuper, square_distance, index_points),
    # externally supplied attn1/norm3 modules and data-dependent gathers; omitted.
    return out.reshape(B, N, C)


# --------------------------------------------------------------------------
# Deterministic parameter construction + smoke test
# --------------------------------------------------------------------------

def make_params(key, dim, num_heads, num_tokens, mlp_ratio=4.0):
    hidden = int(dim * mlp_ratio)
    ks = jax.random.split(key, 10)
    return {
        "num_heads": num_heads,
        "ln1_g": jnp.ones((dim,), jnp.float32),
        "ln1_b": jnp.zeros((dim,), jnp.float32),
        "ln2_g": jnp.ones((dim,), jnp.float32),
        "ln2_b": jnp.zeros((dim,), jnp.float32),
        # nn.Linear(dim, 3*dim, bias=False), stored in math layout (in, out)
        "w_qkv": jax.random.normal(ks[0], (dim, 3 * dim), jnp.float32) * 0.02,
        "w_proj": jax.random.normal(ks[1], (dim, dim), jnp.float32) * 0.02,
        "b_proj": jax.random.normal(ks[2], (dim,), jnp.float32) * 0.02,
        "w1": jax.random.normal(ks[3], (dim, hidden), jnp.float32) * 0.02,
        "b1": jax.random.normal(ks[4], (hidden,), jnp.float32) * 0.02,
        "w2": jax.random.normal(ks[5], (hidden, dim), jnp.float32) * 0.02,
        "b2": jax.random.normal(ks[6], (dim,), jnp.float32) * 0.02,
        # Attention.gate is nn.Parameter(zeros(1, 6, 1, 1)) -> per-head scalar (H=6).
        # Non-zero init so the prompt path is exercised.
        "gate": jax.random.normal(ks[7], (num_heads,), jnp.float32) * 0.1,
        # Block.ad_gate is nn.Parameter(zeros(1)); non-zero init for a non-trivial test.
        "ad_gate": jax.random.normal(ks[8], (1,), jnp.float32) * 0.1,
        # prompt_embeddings: trunc_normal_(std=0.02)
        "prompt": jax.random.normal(ks[9], (num_tokens, dim), jnp.float32) * 0.02,
    }


if __name__ == "__main__":
    B, N = 2, 8             # batch, tokens
    dim, num_heads = 48, 6  # head_dim = 8; gate parameter shape (1, 6, 1, 1) -> H must be 6
    num_tokens = 4          # prompt length

    key = jax.random.PRNGKey(0)
    kx, kp = jax.random.split(key)
    x = jax.random.normal(kx, (B, N, dim), jnp.float32)
    params = make_params(kp, dim, num_heads, num_tokens)

    out = block_forward(params, x)   # f32 MXU inputs by default (exact nn.Linear numerics)
    jax.block_until_ready(out)
    assert out.shape == (B, N, dim)
    assert bool(jnp.all(jnp.isfinite(out)))
    print("KERNEL_OK")
</pallas_src>

<mosaic_0001>
module attributes {stable_mosaic.version = 11 : i64} {
  func.func @_matmul_kernel(%arg0: memref<4x48xf32, #tpu.memory_space<vmem>>, %arg1: memref<48x144xf32, #tpu.memory_space<vmem>>, %arg2: memref<4x144xf32, #tpu.memory_space<vmem>>) attributes {dimension_semantics = [], scalar_prefetch = 0 : i64, scratch_operands = 0 : i64, tpu.core_type = #tpu.core_type<tc>} {
    %c0 = arith.constant 0 : index
    %c0_0 = arith.constant 0 : index
    %0 = vector.load %arg0[%c0, %c0_0] : memref<4x48xf32, #tpu.memory_space<vmem>>, vector<4x48xf32>
    %c0_1 = arith.constant 0 : index
    %c0_2 = arith.constant 0 : index
    %1 = vector.load %arg1[%c0_1, %c0_2] : memref<48x144xf32, #tpu.memory_space<vmem>>, vector<48x144xf32>
    %cst = arith.constant dense<0.000000e+00> : vector<4x144xf32>
    %2 = tpu.matmul %0, %1, %cst {dimension_numbers = #tpu.dot_dimension_numbers<[1], [0], [0], [1], [0, 0, 1, 1], [], []>} : vector<4x48xf32>, vector<48x144xf32>, vector<4x144xf32> -> vector<4x144xf32>
    %c0_3 = arith.constant 0 : index
    %c0_4 = arith.constant 0 : index
    %3 = vector.load %arg2[%c0_3, %c0_4] : memref<4x144xf32, #tpu.memory_space<vmem>>, vector<4x144xf32>
    tpu.vector_store %arg2[%c0_3, %c0_4], %2 {strides = array<i32>} : memref<4x144xf32, #tpu.memory_space<vmem>>, vector<4x144xf32>,
    return
  }
}

</mosaic_0001>

<bundles_post_ra>
// kernel: tpu_custom_call.1
= control target key start
LH: loop header
LB: loop body
LE: loop exit
PB: predicated region body
PF: predicated region fallthrough
CT: control target
= control target key end

     0   :  { %7 = vsyncpa [#allocation3], 0  ;;  %s305_s0 = inlined_call_operand.hbm [shape: f32[4,48], index: 0, kind: input, shape index: {}]   ;;  %s306_s1 = inlined_call_operand.hbm [shape: f32[48,144], index: 1, kind: input, shape index: {}]   ;;  %s307_s2 = inlined_call_operand.hbm [shape: f32[4,144], index: 2, kind: output, shape index: {}]  }
   0x1   :  { %8 = vsyncpa [#allocation6], 0 }
   0x2   :  { %9 = vsyncpa [#allocation4], 0  ;;  %s241_s9 = smov [#allocation2]   ;;  %s242_s11 = smov [#allocation5]  }
   0x3   :  { %s16_s10 = sshll.u32 %s241_s9, 4  ;;  %s25_s12 = sshll.u32 %s242_s11, 4  ;;  %s17_s10 = int_to_ptr.vmem [resolvable:$true] %s16_s10  ;;  %s262_s12 = int_to_ptr.vmem [resolvable:$true] %s25_s12 }
   0x4   :  { %s169_s15 = scalar_lea.hbm %s305_s0, 64 }
   0x5   :  { %p170_p0 = scmp.ne.s32.totalorder %s305_s0, %s169_s15  ;;  %p173_p1 = scmp.lt.u32.totalorder %s169_s15, %s305_s0 }
   0x7   :  { %p175_p2 = pnand %p173_p1, %p170_p0 }
   0x9   :  { %178 = shalt.err (!%p175_p2)
}
   0xa   :  { %s179_s20 = scalar_lea.vmem %s17_s10, 64  ;;  %p184_p4 = scmp.lt.s32.totalorder %s17_s10, %s17_s10 }
   0xb   :  { %p180_p3 = scmp.ne.s32.totalorder %s17_s10, %s179_s20  ;;  %p185_p5 = scmp.lt.s32.totalorder %s179_s20, %s179_s20 }
   0xd   :  { %p186_p6 = por %p185_p5, %p184_p4 }
   0xf   :  { %p187_p7 = pnand %p186_p6, %p180_p3 }
  0x11   :  { %190 = shalt.err (!%p187_p7)
}
  0x12   :  { %19 = dma.hbm_to_vmem [thread:$0]  %s305_s0, 64, %s17_s10, [#allocation3]  }
  0x13   :  { %s191_s25 = scalar_lea.hbm %s306_s1, 1536 }
  0x14   :  { %p192_p8 = scmp.ne.s32.totalorder %s306_s1, %s191_s25  ;;  %p195_p9 = scmp.lt.u32.totalorder %s191_s25, %s306_s1 }
  0x16   :  { %p197_p10 = pnand %p195_p9, %p192_p8 }
  0x18   :  { %200 = shalt.err (!%p197_p10)
}
  0x19   :  { %s201_s30 = scalar_lea.vmem %s262_s12, 1536  ;;  %p206_p12 = scmp.lt.s32.totalorder %s262_s12, %s262_s12 }
  0x1a   :  { %p202_p11 = scmp.ne.s32.totalorder %s262_s12, %s201_s30  ;;  %p207_p13 = scmp.lt.s32.totalorder %s201_s30, %s201_s30 }
  0x1c   :  { %p208_p0 = por %p207_p13, %p206_p12 }
  0x1e   :  { %p209_p1 = pnand %p208_p0, %p202_p11 }
  0x20   :  { %212 = shalt.err (!%p209_p1)
}
  0x21   :  { %s243_s0 = smov 256   ;;  %s244_s3 = smov 16  }
  0x22   :  { %31 = dma.hbm_to_vmem [thread:$0]  %s306_s1, 1536, %s262_s12, [#allocation6], %s243_s0, %s243_s0, %s244_s3  }
  0x23   :  { %235 = dma.done.wait [#allocation3], 64  }
  0x24   :  { %236 = vsyncadd [#allocation3], 4294967232 }
  0x25   :  { %237 = dma.done.wait [#allocation6], 1536  }
  0x26   :  { %238 = vsyncadd [#allocation6], 4294965760  ;;  %v245_v0 = vmov 0.0   ;;  %v40_v1 = vld [vmem:[#allocation5 + $0x8] sm:$0xff]  ;;  %v42_v2 = vld [vmem:[#allocation5 + $0x18] sm:$0xff]  ;;  %vm51_vm0 = vcmask 392192  }
  0x27   :  { %119 = vmatprep.mubr.f32.mxu0 %v245_v0  ;;  %v39_v3 = vld [vmem:[#allocation5] sm:$0xff]  ;;  %v151_v4 = vpack.c.bf16 %v42_v2, %v40_v1  ;;  %v41_v5 = vld [vmem:[#allocation5 + $0x10] sm:$0xff]  ;;  %v44_v6 = vld [vmem:[#allocation5 + $0x28] sm:$0xff]  ;;  %vm130_vm1 = vcmask 1043456   ;;  %vm131_vm2 = vcmask 130052   ;;  %s246_s1 = smov [#allocation7]  }
  0x28   :  { %v46_v7 = vld [vmem:[#allocation5 + $0x38] sm:$0xff]  ;;  %v153_v8 = vpack.c.bf16 %v41_v5, %v39_v3  ;;  %v43_v10 = vld [vmem:[#allocation5 + $0x20] sm:$0xff]  ;;  %v45_v11 = vld [vmem:[#allocation5 + $0x30] sm:$0xff]  ;;  %s140_s6 = sshll.u32 %s246_s1, 4  ;;  %s141_s6 = int_to_ptr.vmem [resolvable:$true] %s140_s6 }
  0x29   :  { %v155_v9 = vpack.c.bf16 %v46_v7, %v44_v6  ;;  %v48_v12 = vld [vmem:[#allocation5 + $0x48] sm:$0xff]  ;;  %152 = vmatprep.subr.bf16.mxu0 %v151_v4  ;;  %v50_v13 = vld [vmem:[#allocation5 + $0x58] sm:$0xff]  ;;  %v157_v14 = vpack.c.bf16 %v45_v11, %v43_v10  ;;  %v47_v16 = vld [vmem:[#allocation5 + $0x40] sm:$0xff]  ;;  %s213_s7 = scalar_lea.vmem %s141_s6, 128  ;;  %p218_p3 = scmp.lt.s32.totalorder %s141_s6, %s141_s6 }
  0x2a   :  { %154 = vmatpush1.bf16.msra.mxu0 %v153_v8  ;;  %v159_v15 = vpack.c.bf16 %v50_v13, %v48_v12  ;;  %v49_v17 = vld [vmem:[#allocation5 + $0x50] sm:$0xff]  ;;  %v38_v19 = vld [vmem:[#allocation2] sm:$0xf]  ;;  %vm132_vm3 = vmor %vm131_vm2, %vm130_vm1  ;;  %p214_p2 = scmp.ne.s32.totalorder %s141_s6, %s213_s7  ;;  %p219_p4 = scmp.lt.s32.totalorder %s213_s7, %s213_s7 }
  0x2b   :  { %156 = vmatprep.subr.bf16.mxu0 %v155_v9  ;;  %v161_v18 = vpack.c.bf16 %v49_v17, %v47_v16 }
  0x2c   :  { %p220_p5 = por %p219_p4, %p218_p3 }
  0x2e   :  { %158 = vmatpush1.bf16.msra.mxu0 %v157_v14  ;;  %p221_p6 = pnand %p220_p5, %p214_p2 }
  0x2f   :  { %160 = vmatprep.subr.bf16.mxu0 %v159_v15 }
  0x32   :  { %162 = vmatpush1.bf16.msra.mxu0 %v161_v18 }
  0x35   :  { %150 = vmatmul.mubr.msk.f32.vlgmr.msra.gmra.mrb[0].mxu0 %vm51_vm0, %v38_v19 }
 0x108   :  { %v121_v20 = vpop.f32.mrb[0].mxu0 }
 0x109   :  { %v123_v21 = vpop.f32.mrb[1].mxu0 }
 0x10a   :  { %v128_v22 = vcombine.low %v121_v20, %v123_v21 }
 0x10c   :  { %133 = vst.msk [vmem:[#allocation7] sm:$0xff] %vm132_vm3, %v128_v22 }
 0x10d   :  { %224 = shalt.err (!%p221_p6)
}
 0x10e   :  { %s225_s10 = scalar_lea.hbm %s307_s2, 128 }
 0x10f   :  { %p226_p7 = scmp.ne.s32.totalorder %s307_s2, %s225_s10  ;;  %p229_p8 = scmp.lt.u32.totalorder %s225_s10, %s307_s2 }
 0x111   :  { %p231_p9 = pnand %p229_p8, %p226_p7 }
 0x113   :  { %234 = shalt.err (!%p231_p9)
}
 0x114   :  { %143 = dma.vmem_to_hbm [thread:$0]  %s141_s6, 128, %s307_s2, [#allocation4]  }
 0x115   :  { %239 = dma.done.wait [#allocation4], 128  }
 0x116   :  { %240 = vsyncadd [#allocation4], 4294967168 }
 0x117   :  { %147 = vsyncpa [#allocation3], 1 }
 0x118   :  { %148 = vsyncpa [#allocation6], 1 }
 0x119   :  { %149 = vsyncpa [#allocation4], 1 }

</bundles_post_ra>
